<compile_context>
chip_gen: v5e
topology: v5e:2x2
jax: 0.10.0
libtpu: 0.0.40
codegen_flags: <defaults>
</compile_context>

<pallas_src>
import jax
import jax.numpy as jnp
from jax.experimental import pallas as pl
from jax.experimental.pallas import tpu as pltpu

# original (PyTorch) dims
IN_F = 2
HID = 100
OUT_F = 3

# TPU-aligned (padded) dims
LANE = 128
HID_P = LANE       # hidden width padded to one full vreg lane dim
OUT_W = 8          # classes padded to 8 lanes (block last dim == full array dim is legal)

# rows of the packed f32 constants array (w1 rows + hidden biases)
_ROW_W1_0 = 0      # w1[0, :]  (input feature 0)
_ROW_W1_1 = 1      # w1[1, :]  (input feature 1)
_ROW_B1 = 2
_ROW_B2 = 3
_ROW_B3 = 4
_CONST_ROWS = 8
_NEG_BIG = -1e30   # folded into the fc4 bias on padded class lanes -> exp underflows to 0


def mlp_kernel(x_ref, c_ref, w2_ref, w3_ref, w4_ref, b4_ref, o_ref):
    x = x_ref[...]            # (bt, 2)   f32
    c = c_ref[...]            # (8, 128)  f32  (w1 rows + hidden biases)

    # ---- layer 1 on the VPU: h1 = x0 * w1_row0 + x1 * w1_row1 + b1  (no MXU padding work)
    h1 = (x[:, 0:1] * c[_ROW_W1_0:_ROW_W1_0 + 1, :]
          + x[:, 1:2] * c[_ROW_W1_1:_ROW_W1_1 + 1, :]
          + c[_ROW_B1:_ROW_B1 + 1, :])
    h1 = jnp.maximum(h1, 0.0).astype(jnp.bfloat16)

    # ---- layers 2/3: bf16 MXU matmuls, f32 accumulation
    h2 = jnp.dot(h1, w2_ref[...], preferred_element_type=jnp.float32) \
        + c[_ROW_B2:_ROW_B2 + 1, :]
    h2 = jnp.maximum(h2, 0.0).astype(jnp.bfloat16)

    h3 = jnp.dot(h2, w3_ref[...], preferred_element_type=jnp.float32) \
        + c[_ROW_B3:_ROW_B3 + 1, :]
    h3 = jnp.maximum(h3, 0.0).astype(jnp.bfloat16)

    # ---- layer 4: 8-lane-wide logits; bias already holds -1e30 on padded class lanes 3..7,
    #      so the softmax below is automatically restricted to the OUT_F real classes.
    logits = jnp.dot(h3, w4_ref[...], preferred_element_type=jnp.float32) + b4_ref[...]

    # ---- softmax over the (narrow) class axis
    m = jnp.max(logits, axis=-1, keepdims=True)
    e = jnp.exp(logits - m)
    denom = jnp.sum(e, axis=-1, keepdims=True)
    o_ref[...] = (e * pl.reciprocal(denom, approx=True)).astype(o_ref.dtype)


def _round_up(n, m):
    return ((n + m - 1) // m) * m


def _pad2(a, rows, cols, dtype):
    out = jnp.zeros((rows, cols), dtype)
    return out.at[: a.shape[0], : a.shape[1]].set(a.astype(dtype))


def prepare_params(params):
    """One-time packing/padding of the unpadded params (weights already (in_features, out_features))."""
    consts = jnp.zeros((_CONST_ROWS, LANE), jnp.float32)
    consts = consts.at[_ROW_W1_0, :HID].set(params["w1"][0])
    consts = consts.at[_ROW_W1_1, :HID].set(params["w1"][1])
    consts = consts.at[_ROW_B1, :HID].set(params["b1"])
    consts = consts.at[_ROW_B2, :HID].set(params["b2"])
    consts = consts.at[_ROW_B3, :HID].set(params["b3"])

    # fc4 bias, 8 lanes wide, with -1e30 on the padded class lanes (softmax mask folded in)
    b4m = jnp.full((1, OUT_W), _NEG_BIG, jnp.float32).at[0, :OUT_F].set(params["b4"])

    return dict(
        consts=consts,
        w2=_pad2(params["w2"], HID_P, HID_P, jnp.bfloat16),
        w3=_pad2(params["w3"], HID_P, HID_P, jnp.bfloat16),
        w4=_pad2(params["w4"], HID_P, OUT_W, jnp.bfloat16),
        b4m=b4m,
    )


def net_forward(x, prepared, *, block_b=2048):
    """x: (B, 2) float32.  prepared: output of prepare_params()."""
    B = x.shape[0]

    # Tile the batch so that (a) the grid has an even number of steps >= 2 (both v7x TensorCores
    # get work under ("parallel",)), (b) padding waste is < 8 rows per tile, and (c) tiles stay
    # around block_b rows so per-step overhead (~0.35 us) is amortized while VMEM stays bounded
    # (well under the 32 MiB default scoped limit at block_b=2048).
    n_tiles = max(2, -(-B // block_b))
    n_tiles += n_tiles % 2                       # even step count balances v7x's two cores
    b_tile = _round_up(-(-B // n_tiles), 8)
    B_pad = n_tiles * b_tile

    # batch-pad x only (feature dim stays at 2 -> minimal input HBM traffic)
    x_p = jnp.zeros((B_pad, IN_F), jnp.float32).at[:B].set(x.astype(jnp.float32))

    resident = lambda shape: pl.BlockSpec(shape, lambda i: (0, 0))   # VMEM-resident across steps

    w_bytes = (prepared["consts"].nbytes + prepared["w2"].nbytes + prepared["w3"].nbytes
               + prepared["w4"].nbytes + prepared["b4m"].nbytes)
    cost = pl.CostEstimate(
        flops=2 * B_pad * (IN_F * HID_P + 2 * HID_P * HID_P + HID_P * OUT_W),
        transcendentals=B_pad * OUT_W,
        bytes_accessed=x_p.nbytes + w_bytes + B_pad * OUT_W * 4,
    )

    out_p = pl.pallas_call(
        mlp_kernel,
        out_shape=jax.ShapeDtypeStruct((B_pad, OUT_W), jnp.float32),
        grid=(n_tiles,),
        in_specs=[
            pl.BlockSpec((b_tile, IN_F), lambda i: (i, 0)),   # streamed batch tile of x
            resident((_CONST_ROWS, LANE)),                    # packed w1 rows + hidden biases (f32)
            resident((HID_P, HID_P)),                         # w2 (bf16)
            resident((HID_P, HID_P)),                         # w3 (bf16)
            resident((HID_P, OUT_W)),                         # w4 (bf16, 8 output lanes)
            resident((1, OUT_W)),                             # fc4 bias + padded-class mask (f32)
        ],
        out_specs=pl.BlockSpec((b_tile, OUT_W), lambda i: (i, 0)),
        compiler_params=pltpu.CompilerParams(
            dimension_semantics=("parallel",)),
        cost_estimate=cost,
    )(x_p, prepared["consts"], prepared["w2"], prepared["w3"], prepared["w4"], prepared["b4m"])

    # TODO(synk): if a v5e bundle dump shows the single vst slot saturating at large b_tile,
    # sub-tile the elementwise chain with an unrolled lax.fori_loop over 256-row pl.ds slices.
    return out_p[:B, :OUT_F]


def init_params(key):
    """Deterministic init mimicking nn.Linear (uniform +/- 1/sqrt(fan_in)); weights stored (in, out)."""
    ks = jax.random.split(key, 8)

    def lin(kw, kb, fan_in, fan_out):
        bound = 1.0 / jnp.sqrt(jnp.float32(fan_in))
        w = jax.random.uniform(kw, (fan_in, fan_out), jnp.float32, -bound, bound)
        b = jax.random.uniform(kb, (fan_out,), jnp.float32, -bound, bound)
        return w, b

    w1, b1 = lin(ks[0], ks[1], IN_F, HID)
    w2, b2 = lin(ks[2], ks[3], HID, HID)
    w3, b3 = lin(ks[4], ks[5], HID, HID)
    w4, b4 = lin(ks[6], ks[7], HID, OUT_F)
    return dict(w1=w1, b1=b1, w2=w2, b2=b2, w3=w3, b3=b3, w4=w4, b4=b4)


def reference_forward(x, p):
    h = jnp.maximum(x @ p["w1"] + p["b1"], 0.0)
    h = jnp.maximum(h @ p["w2"] + p["b2"], 0.0)
    h = jnp.maximum(h @ p["w3"] + p["b3"], 0.0)
    logits = h @ p["w4"] + p["b4"]
    return jax.nn.softmax(logits, axis=1)


if __name__ == "__main__":
    key = jax.random.PRNGKey(0)
    k_param, k_x = jax.random.split(key)
    params = init_params(k_param)
    prepared = prepare_params(params)          # one-time weight packing (hoisted out of forward)

    # small shapes: B=8 (aligned), B=5 (batch padding), B=33 (uneven split across 2 grid steps)
    for B in (8, 5, 33):
        x = jax.random.normal(jax.random.fold_in(k_x, B), (B, IN_F), jnp.float32)

        out = jax.block_until_ready(net_forward(x, prepared))
        ref = reference_forward(x, params)

        assert out.shape == (B, OUT_F), out.shape
        # bf16 matmuls + approx reciprocal -> compare at ~1e-2 abs tolerance (softmax in [0,1])
        assert jnp.allclose(out, ref, atol=2e-2, rtol=0.0), "mismatch vs pure-JAX reference"
        assert jnp.allclose(jnp.sum(out, axis=1), 1.0, atol=1e-2), "softmax rows must sum to ~1"

    print("KERNEL_OK")
</pallas_src>

<mosaic_0001>
module attributes {stable_mosaic.version = 11 : i64} {
  func.func @mlp_kernel(%arg0: i32, %arg1: memref<8x2xf32, #tpu.memory_space<vmem>>, %arg2: memref<8x128xf32, #tpu.memory_space<vmem>>, %arg3: memref<128x128xbf16, #tpu.memory_space<vmem>>, %arg4: memref<128x128xbf16, #tpu.memory_space<vmem>>, %arg5: memref<128x8xbf16, #tpu.memory_space<vmem>>, %arg6: memref<1x8xf32, #tpu.memory_space<vmem>>, %arg7: memref<8x8xf32, #tpu.memory_space<vmem>>) attributes {dimension_semantics = [#tpu.dimension_semantics<parallel>], iteration_bounds = array<i64: 2>, scalar_prefetch = 0 : i64, scratch_operands = 0 : i64, tpu.core_type = #tpu.core_type<tc>, window_params = [{transform_indices = @transform_0, window_bounds = array<i64: 8, 2>}, {pipeline_mode = #tpu.pipeline_mode<synchronous>, transform_indices = @transform_1, window_bounds = array<i64: 8, 128>}, {pipeline_mode = #tpu.pipeline_mode<synchronous>, transform_indices = @transform_2, window_bounds = array<i64: 128, 128>}, {pipeline_mode = #tpu.pipeline_mode<synchronous>, transform_indices = @transform_3, window_bounds = array<i64: 128, 128>}, {pipeline_mode = #tpu.pipeline_mode<synchronous>, transform_indices = @transform_4, window_bounds = array<i64: 128, 8>}, {pipeline_mode = #tpu.pipeline_mode<synchronous>, transform_indices = @transform_5, window_bounds = array<i64: 1, 8>}, {transform_indices = @transform_6, window_bounds = array<i64: 8, 8>}]} {
    %c0 = arith.constant 0 : index
    %c0_0 = arith.constant 0 : index
    %0 = vector.load %arg1[%c0, %c0_0] : memref<8x2xf32, #tpu.memory_space<vmem>>, vector<8x2xf32>
    %c0_1 = arith.constant 0 : index
    %c0_2 = arith.constant 0 : index
    %1 = vector.load %arg2[%c0_1, %c0_2] : memref<8x128xf32, #tpu.memory_space<vmem>>, vector<8x128xf32>
    %2 = vector.extract_strided_slice %0 {offsets = [0, 0], sizes = [8, 1], strides = [1, 1]} : vector<8x2xf32> to vector<8x1xf32>
    %3 = vector.extract_strided_slice %1 {offsets = [0, 0], sizes = [1, 128], strides = [1, 1]} : vector<8x128xf32> to vector<1x128xf32>
    %4 = vector.broadcast %2 : vector<8x1xf32> to vector<8x128xf32>
    %5 = vector.broadcast %3 : vector<1x128xf32> to vector<8x128xf32>
    %6 = arith.mulf %4, %5 : vector<8x128xf32>
    %7 = vector.extract_strided_slice %0 {offsets = [0, 1], sizes = [8, 1], strides = [1, 1]} : vector<8x2xf32> to vector<8x1xf32>
    %8 = vector.extract_strided_slice %1 {offsets = [1, 0], sizes = [1, 128], strides = [1, 1]} : vector<8x128xf32> to vector<1x128xf32>
    %9 = vector.broadcast %7 : vector<8x1xf32> to vector<8x128xf32>
    %10 = vector.broadcast %8 : vector<1x128xf32> to vector<8x128xf32>
    %11 = arith.mulf %9, %10 : vector<8x128xf32>
    %12 = arith.addf %6, %11 : vector<8x128xf32>
    %13 = vector.extract_strided_slice %1 {offsets = [2, 0], sizes = [1, 128], strides = [1, 1]} : vector<8x128xf32> to vector<1x128xf32>
    %14 = vector.broadcast %13 : vector<1x128xf32> to vector<8x128xf32>
    %15 = arith.addf %12, %14 : vector<8x128xf32>
    %cst = arith.constant 0.000000e+00 : f32
    %16 = vector.broadcast %cst : f32 to vector<8x128xf32>
    %17 = arith.maximumf %15, %16 : vector<8x128xf32>
    %18 = arith.truncf %17 : vector<8x128xf32> to vector<8x128xbf16>
    %c0_3 = arith.constant 0 : index
    %c0_4 = arith.constant 0 : index
    %19 = vector.load %arg3[%c0_3, %c0_4] : memref<128x128xbf16, #tpu.memory_space<vmem>>, vector<128x128xbf16>
    %cst_5 = arith.constant dense<0.000000e+00> : vector<8x128xf32>
    %20 = tpu.matmul %18, %19, %cst_5 {dimension_numbers = #tpu.dot_dimension_numbers<[1], [0], [0], [1], [0, 0, 1, 1], [], []>} : vector<8x128xbf16>, vector<128x128xbf16>, vector<8x128xf32> -> vector<8x128xf32>
    %21 = vector.extract_strided_slice %1 {offsets = [3, 0], sizes = [1, 128], strides = [1, 1]} : vector<8x128xf32> to vector<1x128xf32>
    %22 = vector.broadcast %21 : vector<1x128xf32> to vector<8x128xf32>
    %23 = arith.addf %20, %22 : vector<8x128xf32>
    %cst_6 = arith.constant 0.000000e+00 : f32
    %24 = vector.broadcast %cst_6 : f32 to vector<8x128xf32>
    %25 = arith.maximumf %23, %24 : vector<8x128xf32>
    %26 = arith.truncf %25 : vector<8x128xf32> to vector<8x128xbf16>
    %c0_7 = arith.constant 0 : index
    %c0_8 = arith.constant 0 : index
    %27 = vector.load %arg4[%c0_7, %c0_8] : memref<128x128xbf16, #tpu.memory_space<vmem>>, vector<128x128xbf16>
    %cst_9 = arith.constant dense<0.000000e+00> : vector<8x128xf32>
    %28 = tpu.matmul %26, %27, %cst_9 {dimension_numbers = #tpu.dot_dimension_numbers<[1], [0], [0], [1], [0, 0, 1, 1], [], []>} : vector<8x128xbf16>, vector<128x128xbf16>, vector<8x128xf32> -> vector<8x128xf32>
    %29 = vector.extract_strided_slice %1 {offsets = [4, 0], sizes = [1, 128], strides = [1, 1]} : vector<8x128xf32> to vector<1x128xf32>
    %30 = vector.broadcast %29 : vector<1x128xf32> to vector<8x128xf32>
    %31 = arith.addf %28, %30 : vector<8x128xf32>
    %cst_10 = arith.constant 0.000000e+00 : f32
    %32 = vector.broadcast %cst_10 : f32 to vector<8x128xf32>
    %33 = arith.maximumf %31, %32 : vector<8x128xf32>
    %34 = arith.truncf %33 : vector<8x128xf32> to vector<8x128xbf16>
    %c0_11 = arith.constant 0 : index
    %c0_12 = arith.constant 0 : index
    %35 = vector.load %arg5[%c0_11, %c0_12] : memref<128x8xbf16, #tpu.memory_space<vmem>>, vector<128x8xbf16>
    %cst_13 = arith.constant dense<0.000000e+00> : vector<8x8xf32>
    %36 = tpu.matmul %34, %35, %cst_13 {dimension_numbers = #tpu.dot_dimension_numbers<[1], [0], [0], [1], [0, 0, 1, 1], [], []>} : vector<8x128xbf16>, vector<128x8xbf16>, vector<8x8xf32> -> vector<8x8xf32>
    %c0_14 = arith.constant 0 : index
    %c0_15 = arith.constant 0 : index
    %37 = vector.load %arg6[%c0_14, %c0_15] : memref<1x8xf32, #tpu.memory_space<vmem>>, vector<1x8xf32>
    %38 = vector.broadcast %37 : vector<1x8xf32> to vector<8x8xf32>
    %39 = arith.addf %36, %38 : vector<8x8xf32>
    %cst_16 = arith.constant dense<0xFF800000> : vector<8xf32>
    %40 = vector.multi_reduction <maximumf>, %39, %cst_16 [1] : vector<8x8xf32> to vector<8xf32>
    %41 = vector.shape_cast %40 : vector<8xf32> to vector<8x1xf32>
    %42 = vector.broadcast %41 : vector<8x1xf32> to vector<8x8xf32>
    %43 = arith.subf %39, %42 : vector<8x8xf32>
    %44 = math.exp %43 : vector<8x8xf32>
    %cst_17 = arith.constant dense<0.000000e+00> : vector<8xf32>
    %45 = vector.multi_reduction <add>, %44, %cst_17 [1] : vector<8x8xf32> to vector<8xf32>
    %46 = vector.shape_cast %45 : vector<8xf32> to vector<8x1xf32>
    %47 = tpu.reciprocal %46 {approx = true} : vector<8x1xf32> -> vector<8x1xf32>
    %48 = vector.broadcast %47 : vector<8x1xf32> to vector<8x8xf32>
    %49 = arith.mulf %44, %48 : vector<8x8xf32>
    %c0_18 = arith.constant 0 : index
    %c0_19 = arith.constant 0 : index
    %50 = vector.load %arg7[%c0_18, %c0_19] : memref<8x8xf32, #tpu.memory_space<vmem>>, vector<8x8xf32>
    tpu.vector_store %arg7[%c0_18, %c0_19], %49 {strides = array<i32>} : memref<8x8xf32, #tpu.memory_space<vmem>>, vector<8x8xf32>,
    return
  }
  func.func @transform_0(%arg0: i32) -> (i32, i32) {
    %c0_i32 = arith.constant 0 : i32
    %c0_i32_0 = arith.constant 0 : i32
    return %arg0, %c0_i32 : i32, i32
  }
  func.func @transform_1(%arg0: i32) -> (i32, i32) {
    %c0_i32 = arith.constant 0 : i32
    %c0_i32_0 = arith.constant 0 : i32
    %c0_i32_1 = arith.constant 0 : i32
    return %c0_i32, %c0_i32_0 : i32, i32
  }
  func.func @transform_2(%arg0: i32) -> (i32, i32) {
    %c0_i32 = arith.constant 0 : i32
    %c0_i32_0 = arith.constant 0 : i32
    %c0_i32_1 = arith.constant 0 : i32
    return %c0_i32, %c0_i32_0 : i32, i32
  }
  func.func @transform_3(%arg0: i32) -> (i32, i32) {
    %c0_i32 = arith.constant 0 : i32
    %c0_i32_0 = arith.constant 0 : i32
    %c0_i32_1 = arith.constant 0 : i32
    return %c0_i32, %c0_i32_0 : i32, i32
  }
  func.func @transform_4(%arg0: i32) -> (i32, i32) {
    %c0_i32 = arith.constant 0 : i32
    %c0_i32_0 = arith.constant 0 : i32
    %c0_i32_1 = arith.constant 0 : i32
    return %c0_i32, %c0_i32_0 : i32, i32
  }
  func.func @transform_5(%arg0: i32) -> (i32, i32) {
    %c0_i32 = arith.constant 0 : i32
    %c0_i32_0 = arith.constant 0 : i32
    %c0_i32_1 = arith.constant 0 : i32
    return %c0_i32, %c0_i32_0 : i32, i32
  }
  func.func @transform_6(%arg0: i32) -> (i32, i32) {
    %c0_i32 = arith.constant 0 : i32
    %c0_i32_0 = arith.constant 0 : i32
    return %arg0, %c0_i32 : i32, i32
  }
}

</mosaic_0001>

<bundles_post_ra>
// kernel: tpu_custom_call.1
= control target key start
LH: loop header
LB: loop body
LE: loop exit
PB: predicated region body
PF: predicated region fallthrough
CT: control target
= control target key end

     0   :  { %11 = vsyncpa [#allocation3], 0  ;;  %s846_s21 = smov 0   ;;  %s930_s0 = inlined_call_operand.vmem [shape: f32[16,2], index: 0, kind: input, shape index: {}]   ;;  %s931_s1 = inlined_call_operand.vmem [shape: f32[8,128], index: 1, kind: input, shape index: {}]   ;;  %s932_s2 = inlined_call_operand.vmem [shape: bf16[128,128], index: 2, kind: input, shape index: {}]   ;;  %s933_s3 = inlined_call_operand.hbm [shape: bf16[128,128], index: 3, kind: input, shape index: {}]   ;;  %s934_s4 = inlined_call_operand.vmem [shape: bf16[128,8], index: 4, kind: input, shape index: {}]   ;;  %s935_s5 = inlined_call_operand.vmem [shape: f32[1,8], index: 5, kind: input, shape index: {}]   ;;  %s936_s6 = inlined_call_operand.vmem [shape: f32[16,8], index: 6, kind: output, shape index: {}]  }
   0x1 LB: > { %s196_s24 = sshll.u32 %s933_s3, 4  ;;  %s603_s25 = sadd.s32 4294967295, %s804_s21   ;;  %s804_s21 = sphi %s846_s21, %s17_s21   ;;  %s197_s24 = int_to_ptr.hbm [resolvable:$true] %s196_s24 }
   0x2   : > { %p605_p0 = scmp.ge.s32.totalorder %s804_s21, 1  ;;  %p179_p1 = scmp.lt.s32.totalorder %s804_s21, 3 }
   0x3   : > { %p742_p2 = scmp.eq.s32.totalorder %s603_s25, 0  ;;  %s806_s26 = smov [#allocation2]  }
   0x4   : > { %p180_p3 = pnand %p605_p0, %p179_p1  ;;  %s198_s27 = sshll.u32 %s806_s26, 4  ;;  %s199_s27 = int_to_ptr.vmem [resolvable:$true] %s198_s27 }
   0x5   : > { %s807_s28 = smov 64   ;;  %s808_s29 = smov 4  }
   0x6   : > { %p738_p4 = pneg %p180_p3  ;;  %227 = sbr.rel (%p180_p3) target bundleno = 805 (0x325), region = 44 }
   0x8   : > { %p739_p5 = pnand %p742_p2, %p738_p4 }
   0xa   : > { %741 = dma.hbm_to_vmem [thread:$0]  (!%p739_p5), %s197_s24, 1024, %s199_s27, [#allocation3], %s807_s28, %s807_s28, %s808_s29  }
   0xb   : > { %799 = dma.done.wait (%p742_p2), [#allocation3], 1024  }
   0xc   : > { %801 = vsyncadd (%p742_p2), [#allocation3], 4294966272  ;;  %p256_p6 = scmp.lt.s32.totalorder %s603_s25, 1  ;;  %v809_v0 = vmov 0   ;;  %v717_v2 = vld [vmem:[%s932_s2 + $0x38] sm:$0xff]  ;;  %v716_v3 = vld [vmem:[%s932_s2 + $0x30] sm:$0xff] }
   0xd   : > { %757 = vset.pattern.permute.xlu0 %v809_v0  ;;  %349 = vmatpush.bf16.msra.mxu0 %v717_v2  ;;  %v715_v4 = vld [vmem:[%s932_s2 + $0x28] sm:$0xff]  ;;  %v810_v5 = vmov 1   ;;  %v714_v6 = vld [vmem:[%s932_s2 + $0x20] sm:$0xff]  ;;  %v713_v7 = vld [vmem:[%s932_s2 + $0x18] sm:$0xff]  ;;  %vm525_vm0 = vcmask 64512  }
   0xe   : > { %s938_s25 = smov (!%p256_p6, %s603_s25), 1  ;;  %v712_v8 = vld [vmem:[%s932_s2 + $0x10] sm:$0xff]  ;;  %v711_v9 = vld [vmem:[%s932_s2 + $0x8] sm:$0xff]  ;;  %v710_v10 = vld [vmem:[%s932_s2] sm:$0xff] }
   0xf   : > { %s610_s30 = sshll.u32 %s938_s25, 3  ;;  %v725_v11 = vld [vmem:[#allocation2 + $0x38] sm:$0xff]  ;;  %v724_v12 = vld [vmem:[#allocation2 + $0x30] sm:$0xff]  ;;  %v723_v13 = vld [vmem:[#allocation2 + $0x28] sm:$0xff] }
  0x10   : > { %s259_s9 = scalar_lea.vmem %s930_s0, %s610_s30  ;;  %429 = vmatpush.bf16.msra.mxu1 %v725_v11  ;;  %v722_v14 = vld [vmem:[#allocation2 + $0x20] sm:$0xff]  ;;  %v721_v16 = vld [vmem:[#allocation2 + $0x18] sm:$0xff]  ;;  %v720_v20 = vld [vmem:[#allocation2 + $0x10] sm:$0xff]  ;;  %s263_s29 = scalar_lea.vmem %s936_s6, %s610_s30 }
  0x11   : > { %v264_v1 = vld [vmem:[%s259_s9] sm:$0xff]  ;;  %350 = vmatpush.bf16.msra.mxu0 %v716_v3  ;;  %v719_v29 = vld [vmem:[#allocation2 + $0x8] sm:$0xff]  ;;  %v733_v31 = vld [vmem:[%s934_s4 + $0x38] sm:$0xff] }
  0x12   : > { %268 = vperm.xlu0 %757, %v264_v1   ;;  %v265_v17 = vld [vmem:[%s931_s1] sm:$0xff]  ;;  %512 = vmatpush.bf16.msra.mxu2 %v733_v31  ;;  %v732_v32 = vld [vmem:[%s934_s4 + $0x30] sm:$0xff]  ;;  %v731_v33 = vld [vmem:[%s934_s4 + $0x28] sm:$0xff] }
  0x13   : > { %v271_v18 = vperm.slane %v265_v17, 0  ;;  %v277_v19 = vperm.slane %v265_v17, 1  ;;  %v280_v24 = vperm.slane %v265_v17, 2  ;;  %v718_v30 = vld [vmem:[#allocation2] sm:$0xff]  ;;  %v729_v35 = vld [vmem:[%s934_s4 + $0x18] sm:$0xff]  ;;  %v728_v36 = vld [vmem:[%s934_s4 + $0x10] sm:$0xff] }
  0x14   : > { %430 = vmatpush.bf16.msra.mxu1 %v724_v12  ;;  %v730_v34 = vld [vmem:[%s934_s4 + $0x20] sm:$0xff]  ;;  %v300_v37 = vperm.slane %v265_v17, 3  ;;  %v727_v43 = vld [vmem:[%s934_s4 + $0x8] sm:$0xff]  ;;  %v380_v45 = vperm.slane %v265_v17, 4 }
  0x15   : > { %351 = vmatpush.bf16.msra.mxu0 %v715_v4  ;;  %v726_v44 = vld [vmem:[%s934_s4] sm:$0xff] }
  0x16   : > { %513 = vmatpush.bf16.msra.mxu2 %v732_v32  ;;  %v759_v51 = vld [vmem:[%s935_s5] ss:$0 sm:$0xff] }
  0x18   : > { %431 = vmatpush.bf16.msra.mxu1 %v723_v13 }
  0x19   : > { %352 = vmatpush.bf16.msra.mxu0 %v714_v6 }
  0x1a   : > { %758 = vset.pattern.permute.xlu0 %v810_v5  ;;  %514 = vmatpush.bf16.msra.mxu2 %v731_v33 }
  0x1b   : > { %274 = vperm.xlu0 %758, %v264_v1  }
  0x1c   : > { %432 = vmatpush.bf16.msra.mxu1 %v722_v14 }
  0x1d   : > { %353 = vmatpush.bf16.msra.mxu0 %v713_v7 }
  0x1e   : > { %515 = vmatpush.bf16.msra.mxu2 %v730_v34 }
  0x20   : > { %433 = vmatpush.bf16.msra.mxu1 %v721_v16 }
  0x21   : > { %354 = vmatpush.bf16.msra.mxu0 %v712_v8 }
  0x22   : > { %516 = vmatpush.bf16.msra.mxu2 %v729_v35 }
  0x24   : > { %434 = vmatpush.bf16.msra.mxu1 %v720_v20 }
  0x25   : > { %355 = vmatpush.bf16.msra.mxu0 %v711_v9 }
  0x26   : > { %517 = vmatpush.bf16.msra.mxu2 %v728_v36 }
  0x28   : > { %435 = vmatpush.bf16.msra.mxu1 %v719_v29 }
  0x29   : > { %356 = vmatpush.bf16.msra.mxu0 %v710_v10 }
  0x2a   : > { %518 = vmatpush.bf16.msra.mxu2 %v727_v43 }
  0x2c   : > { %436 = vmatpush.bf16.msra.mxu1 %v718_v30 }
  0x2e   : > { %519 = vmatpush.bf16.msra.mxu2 %v726_v44 }
  0x84   : > { %v269_v15 = vpop.permute.xlu0 %268 }
  0x85   : > { %v272_v22 = vmul.f32 %v271_v18, %v269_v15 }
  0x8d   : > { %v275_v21 = vpop.permute.xlu0 %274 }
  0x8e   : > { %v278_v23 = vmul.f32 %v277_v19, %v275_v21 }
  0x90   : > { %v279_v25 = vadd.f32 %v278_v23, %v272_v22 }
  0x92   : > { %v281_v26 = vadd.f32 %v280_v24, %v279_v25 }
  0x94   : > { %v282_v27 = vmax.f32 %v281_v26, 0.0 }
  0x96   : > { %v283_v28 = vpack.c.bf16 %v282_v27, %v282_v27 }
  0x98   : > { %357 = vmatmul.bf16.vlgmr.msra.gmra.mxu0 %v283_v28 }
 0x115   : > { %v358_v38 = vpop.f32.mrf.mxu0 }
 0x116   : > { %v359_v39 = vadd.f32 %v358_v38, %v300_v37 }
 0x118   : > { %v362_v40 = vmax.f32 %v359_v39, 0.0 }
 0x11a   : > { %v363_v41 = vpack.c.bf16 %v362_v40, %v362_v40 }
 0x11c   : > { %437 = vmatmul.bf16.vlgmr.msra.gmra.mxu1 %v363_v41 }
 0x11d   : > { %v360_v42 = vpop.f32.mrf.mxu0 }
 0x199   : > { %v438_v46 = vpop.f32.mrf.mxu1 }
 0x19a   : > { %v439_v47 = vadd.f32 %v438_v46, %v380_v45 }
 0x19c   : > { %v442_v48 = vmax.f32 %v439_v47, 0.0 }
 0x19e   : > { %v443_v49 = vpack.c.bf16 %v442_v48, %v442_v48 }
 0x1a0   : > { %520 = vmatmul.bf16.vlgmr.msra.gmra.mxu2 %v443_v49 }
 0x1a1   : > { %v440_v50 = vpop.f32.mrf.mxu1 }
 0x223   : > { %v521_v52 = vpop.f32.mrf.mxu2 }
 0x224   : > { %v522_v53 = vadd.f32 %v759_v51, %v521_v52 }
 0x226   : > { %v526_v54 = vsel %vm525_vm0, %v522_v53, -inf }
 0x227   : > { %527 = vmax.xlane.f32.xlu1 %v526_v54 }
 0x22b   : > { %v523_v55 = vpop.f32.mrf.mxu2 }
 0x29a   : > { %v528_v56 = vpop.xlane.xlu1 %527 }
 0x29b   : > { %v529_v57 = vsub.f32 %v522_v53, %v528_v56 }
 0x29d   : > { %v530_v58 = vmul.f32 1.442695, %v529_v57 }
 0x29f   : > { %760 = vpow2.f32 %v530_v58 }
 0x2a5   : > { %v761_v59 = vpop.eup %760 }
 0x2a6   : > { %v532_v60 = vsel %vm525_vm0, %v761_v59, 0.0 }
 0x2a7   : > { %533 = vadd.xlane.f32.xlu1 %v532_v60 }
 0x31a   : > { %v534_v61 = vpop.xlane.xlu1 %533 }
 0x31b   : > { %762 = vrcp.f32 %v534_v61 }
 0x321   : > { %v763_v62 = vpop.eup %762 }
 0x322   : > { %v536_v63 = vmul.f32 %v763_v62, %v761_v59 }
 0x324   : > { %537 = vst.msk [vmem:[%s263_s29] sm:$0xff] %vm525_vm0, %v536_v63 }
 0x325 PF: > { %s17_s21 = sadd.s32 1, %s804_s21  }
 0x326   : > { %p14_p7 = scmp.ge.s32.totalorder %s17_s21, 4  }
 0x328   :  { %16 = sbr.rel (!%p14_p7) target bundleno = 1 (0x1), region = 79 }
 0x32d   :  { %557 = vsyncpa [#allocation3], 1 }
 0x32e   :  { %559 = vsyncpa [#allocation3 + $0x1], 1 }

</bundles_post_ra>
